<compile_context>
chip_gen: v6e
topology: v6e:2x2x1
jax: 0.10.0
libtpu: 0.0.40
codegen_flags: <defaults>
</compile_context>

<pallas_src>
import functools
import math

import jax
import jax.numpy as jnp
from jax import lax
from jax.experimental import pallas as pl
from jax.experimental.pallas import tpu as pltpu


MXU_DTYPE = jnp.bfloat16  # MXU operand / stored-activation dtype (f32 accumulation)


@functools.lru_cache(maxsize=None)
def _vmem_limit_bytes():
    """Per-chip scoped-VMEM budget: ~3/4 of physical, capped at 96 MiB.
    v5e/v6e (128 MiB physical) -> 96 MiB; v7x (64 MiB physical) -> 48 MiB.
    Falls back to the v7x-safe 48 MiB if the hardware query is unavailable."""
    cap = 64 * 1024 * 1024
    try:
        info = pltpu.get_tpu_info()
        cap = int(getattr(info, "vmem_capacity_bytes", cap)) or cap
    except Exception:
        pass
    return min((cap * 3) // 4, 96 * 1024 * 1024)


def _pick_tile(dim, preferred, align):
    """Largest tile <= preferred that is `align`-aligned and divides `dim`;
    falls back to the full dim (always legal: block == array extent)."""
    # TODO(synk): for very large awkwardly-sized dims this fallback should tile with
    #             edge masking instead of one huge block.
    if dim <= preferred:
        return dim
    t = (preferred // align) * align
    while t >= align:
        if dim % t == 0:
            return t
        t -= align
    return dim


# ---------------------------------------------------------------------------
# Tiled linear kernel:  y = (x @ w^T + b) * scale   (w kept torch-style (d_out, d_in))
# ---------------------------------------------------------------------------
def _linear_kernel(x_ref, w_ref, b_ref, o_ref, acc_ref, *, mxu_dtype, scale):
    @pl.when(pl.program_id(2) == 0)
    def _():
        acc_ref[...] = jnp.zeros_like(acc_ref)

    # Contract on the shared d_in axis of x (M, K) and w (N, K): no transpose.
    acc_ref[...] += lax.dot_general(
        x_ref[...].astype(mxu_dtype),
        w_ref[...].astype(mxu_dtype),
        (((1,), (1,)), ((), ())),
        preferred_element_type=jnp.float32,
    )

    @pl.when(pl.program_id(2) == pl.num_programs(2) - 1)
    def _():
        y = acc_ref[...] + b_ref[...].astype(jnp.float32)
        if scale != 1.0:                      # static; folds q's 1/sqrt(d_k) here
            y = y * jnp.float32(scale)
        o_ref[...] = y.astype(o_ref.dtype)


def pallas_linear(x, w, b, *, scale=1.0, out_dtype=None,
                  tm=512, tn=512, tk=None, mxu_dtype=MXU_DTYPE):
    """x: (M, d_in); w: (d_out, d_in) torch layout (bf16 ok); b: (d_out,)."""
    M, d_in = x.shape
    d_out = w.shape[0]
    out_dtype = x.dtype if out_dtype is None else out_dtype
    vmem_limit = _vmem_limit_bytes()
    if tk is None:
        # deeper K tiles only where VMEM headroom allows (v5e/v6e, not v7x)
        tk = 1024 if vmem_limit >= 80 * 1024 * 1024 else 512

    TM = _pick_tile(M, tm, 16)       # 16-row alignment: bf16 sublane packing
    TN = _pick_tile(d_out, tn, 128)
    TK = _pick_tile(d_in, tk, 128)
    grid = (M // TM, d_out // TN, d_in // TK)

    kernel = functools.partial(_linear_kernel, mxu_dtype=mxu_dtype,
                               scale=float(scale))
    return pl.pallas_call(
        kernel,
        out_shape=jax.ShapeDtypeStruct((M, d_out), out_dtype),
        grid=grid,
        in_specs=[
            pl.BlockSpec((TM, TK), lambda i, j, k: (i, k)),
            pl.BlockSpec((TN, TK), lambda i, j, k: (j, k)),
            pl.BlockSpec((1, TN), lambda i, j, k: (0, j)),
        ],
        out_specs=pl.BlockSpec((TM, TN), lambda i, j, k: (i, j)),
        scratch_shapes=[pltpu.VMEM((TM, TN), jnp.float32)],
        compiler_params=pltpu.CompilerParams(
            dimension_semantics=("parallel", "parallel", "arbitrary"),
            vmem_limit_bytes=vmem_limit,
        ),
    )(x, w, b.reshape(1, d_out))


# ---------------------------------------------------------------------------
# Fused attention + fc_o: one batch element (ALL heads) per grid step.
# Inputs are bf16 projections (q already scaled); the fc_o matmul runs on the
# resident (nq, h*d_v) scratch so only a single lane-dense (nq, d_model) block
# is ever stored and no intermediate touches HBM.
# ---------------------------------------------------------------------------
def _mha_fco_kernel(q_ref, k_ref, v_ref, wo_ref, bo_ref, o_ref, av_ref,
                    *, h, d_k, d_v, mxu_dtype):
    # NOTE: head dims (d_k=d_v=16) keep the MXU <=12% utilized per push; at these
    # shapes the kernel is VPU/XLU-bound, so the wins are in slicing/cast/store
    # structure rather than MXU scheduling.
    for hi in range(h):  # static unroll over heads (h is small)
        qh = q_ref[:, hi * d_k:(hi + 1) * d_k]     # (nq, d_k) bf16, pre-scaled
        kh = k_ref[:, hi * d_k:(hi + 1) * d_k]     # (nk, d_k) bf16
        vh = v_ref[:, hi * d_v:(hi + 1) * d_v]     # (nk, d_v) bf16

        # scores = q_scaled @ k^T : contract last axes, no explicit k.T
        s = lax.dot_general(qh, kh, (((1,), (1,)), ((), ())),
                            preferred_element_type=jnp.float32)
        # numerically-stable softmax; denominator deferred to the small output
        s = s - jnp.max(s, axis=-1, keepdims=True)
        p = jnp.exp(s)
        inv_l = pl.reciprocal(jnp.sum(p, axis=-1, keepdims=True), approx=True)
        # TODO(synk): dropout on the attention probs would go here at train time.
        oh = jnp.dot(p.astype(mxu_dtype), vh,
                     preferred_element_type=jnp.float32) * inv_l   # (nq, d_v) f32
        av_ref[:, hi * d_v:(hi + 1) * d_v] = oh

    # Fused fc_o: out = att_out @ W_o^T + b_o  (W_o torch layout (d_model, h*d_v))
    out = lax.dot_general(av_ref[...].astype(mxu_dtype), wo_ref[...],
                          (((1,), (1,)), ((), ())),
                          preferred_element_type=jnp.float32)
    o_ref[...] = (out + bo_ref[...]).astype(o_ref.dtype)


def pallas_attention_fco(q_flat, k_flat, v_flat, wo, bo, *, b_s, nq, nk, h,
                         d_k, d_v, d_model, out_dtype=jnp.float32,
                         mxu_dtype=MXU_DTYPE):
    """q_flat: (b_s*nq, h*d_k) bf16 (scale folded in); k_flat: (b_s*nk, h*d_k) bf16;
    v_flat: (b_s*nk, h*d_v) bf16; wo: (d_model, h*d_v); bo: (d_model,).
    Returns (b_s, nq, d_model)."""
    q3 = q_flat.reshape(b_s, nq, h * d_k)   # free row-major reshapes
    k3 = k_flat.reshape(b_s, nk, h * d_k)
    v3 = v_flat.reshape(b_s, nk, h * d_v)

    kernel = functools.partial(_mha_fco_kernel, h=h, d_k=d_k, d_v=d_v,
                               mxu_dtype=mxu_dtype)
    return pl.pallas_call(
        kernel,
        out_shape=jax.ShapeDtypeStruct((b_s, nq, d_model), out_dtype),
        grid=(b_s,),
        in_specs=[
            pl.BlockSpec((None, nq, h * d_k), lambda bi: (bi, 0, 0)),
            pl.BlockSpec((None, nk, h * d_k), lambda bi: (bi, 0, 0)),
            pl.BlockSpec((None, nk, h * d_v), lambda bi: (bi, 0, 0)),
            pl.BlockSpec((d_model, h * d_v), lambda bi: (0, 0)),   # resident W_o
            pl.BlockSpec((1, d_model), lambda bi: (0, 0)),         # resident b_o
        ],
        out_specs=pl.BlockSpec((None, nq, d_model), lambda bi: (bi, 0, 0)),
        scratch_shapes=[pltpu.VMEM((nq, h * d_v), jnp.float32)],
        compiler_params=pltpu.CompilerParams(
            dimension_semantics=("parallel",),
            vmem_limit_bytes=_vmem_limit_bytes(),
        ),
    )(q3, k3, v3, wo, bo.reshape(1, d_model))


# ---------------------------------------------------------------------------
# Module: parameter init + forward (glue in plain JAX, compute in Pallas)
# ---------------------------------------------------------------------------
def init_params(key, d_model, d_k, d_v, h):
    """nn.Linear weights ~ N(0, 0.001^2), biases = 0 (per init_weights).
    Weights are stored in bf16 (halves weight DMA; matmuls accumulate in f32)."""
    ks = jax.random.split(key, 4)
    std = 0.001

    def w(k, shape):
        return (jax.random.normal(k, shape, jnp.float32) * std).astype(MXU_DTYPE)

    return {
        "fc_q_w": w(ks[0], (h * d_k, d_model)),
        "fc_q_b": jnp.zeros((h * d_k,), jnp.float32),
        "fc_k_w": w(ks[1], (h * d_k, d_model)),
        "fc_k_b": jnp.zeros((h * d_k,), jnp.float32),
        "fc_v_w": w(ks[2], (h * d_v, d_model)),
        "fc_v_b": jnp.zeros((h * d_v,), jnp.float32),
        "fc_o_w": w(ks[3], (d_model, h * d_v)),
        "fc_o_b": jnp.zeros((d_model,), jnp.float32),
    }


@functools.partial(jax.jit, static_argnums=(4, 5, 6, 7))
def scaled_dot_product_attention(params, queries, keys, values,
                                 d_model, d_k, d_v, h):
    b_s, nq, _ = queries.shape
    nk = keys.shape[1]
    scale = 1.0 / math.sqrt(d_k)

    # Projections on flat (batch*seq, feature) views (free reshape); bf16 outputs.
    # The 1/sqrt(d_k) score scale is folded into the q projection epilogue (f32).
    q = pallas_linear(queries.reshape(b_s * nq, d_model),
                      params["fc_q_w"], params["fc_q_b"],
                      scale=scale, out_dtype=MXU_DTYPE)
    k = pallas_linear(keys.reshape(b_s * nk, d_model),
                      params["fc_k_w"], params["fc_k_b"], out_dtype=MXU_DTYPE)
    v = pallas_linear(values.reshape(b_s * nk, d_model),
                      params["fc_v_w"], params["fc_v_b"], out_dtype=MXU_DTYPE)

    # Attention + fc_o fused in one kernel; output already (b_s, nq, d_model).
    return pallas_attention_fco(q, k, v, params["fc_o_w"], params["fc_o_b"],
                                b_s=b_s, nq=nq, nk=nk, h=h, d_k=d_k, d_v=d_v,
                                d_model=d_model, out_dtype=queries.dtype)


# Pure-jnp f32 reference (mirrors the PyTorch forward) for a sanity check.
def _reference(params, queries, keys, values, d_model, d_k, d_v, h):
    b_s, nq, _ = queries.shape
    nk = keys.shape[1]
    wq = params["fc_q_w"].astype(jnp.float32)
    wk = params["fc_k_w"].astype(jnp.float32)
    wv = params["fc_v_w"].astype(jnp.float32)
    wo = params["fc_o_w"].astype(jnp.float32)
    q = queries @ wq.T + params["fc_q_b"]
    k = keys @ wk.T + params["fc_k_b"]
    v = values @ wv.T + params["fc_v_b"]
    q = q.reshape(b_s, nq, h, d_k).transpose(0, 2, 1, 3)
    k = k.reshape(b_s, nk, h, d_k).transpose(0, 2, 3, 1)
    v = v.reshape(b_s, nk, h, d_v).transpose(0, 2, 1, 3)
    att = jnp.matmul(q, k) / math.sqrt(d_k)
    att = jax.nn.softmax(att, axis=-1)
    out = jnp.matmul(att, v).transpose(0, 2, 1, 3).reshape(b_s, nq, h * d_v)
    return out @ wo.T + params["fc_o_b"]


if __name__ == "__main__":
    d_model, d_k, d_v, h = 32, 16, 16, 4
    b_s, nq, nk = 2, 8, 8

    key = jax.random.PRNGKey(0)
    kp, kq, kk, kv = jax.random.split(key, 4)
    params = init_params(kp, d_model, d_k, d_v, h)

    queries = jax.random.normal(kq, (b_s, nq, d_model), jnp.float32)
    keys = jax.random.normal(kk, (b_s, nk, d_model), jnp.float32)
    values = jax.random.normal(kv, (b_s, nk, d_model), jnp.float32)

    out = scaled_dot_product_attention(params, queries, keys, values,
                                       d_model, d_k, d_v, h)
    out = jax.block_until_ready(out)

    ref = _reference(params, queries, keys, values, d_model, d_k, d_v, h)
    assert out.shape == (b_s, nq, d_model)
    # bf16 MXU operands / activations vs f32 reference -> relaxed tolerance.
    assert jnp.allclose(out, ref, atol=2e-6, rtol=3e-2), float(
        jnp.max(jnp.abs(out - ref)))

    print("KERNEL_OK")
</pallas_src>

<mosaic_0001>
module attributes {stable_mosaic.version = 11 : i64} {
  func.func @_linear_kernel(%arg0: i32, %arg1: i32, %arg2: i32, %arg3: memref<16x32xf32, #tpu.memory_space<vmem>>, %arg4: memref<64x32xbf16, #tpu.memory_space<vmem>>, %arg5: memref<1x64xf32, #tpu.memory_space<vmem>>, %arg6: memref<16x64xbf16, #tpu.memory_space<vmem>>, %arg7: memref<16x64xf32, #tpu.memory_space<vmem>>) attributes {dimension_semantics = [#tpu.dimension_semantics<parallel>, #tpu.dimension_semantics<parallel>, #tpu.dimension_semantics<arbitrary>], iteration_bounds = array<i64: 1, 1, 1>, scalar_prefetch = 0 : i64, scratch_operands = 1 : i64, tpu.core_type = #tpu.core_type<tc>, window_params = [{transform_indices = @transform_0, window_bounds = array<i64: 16, 32>}, {transform_indices = @transform_1, window_bounds = array<i64: 64, 32>}, {transform_indices = @transform_2, window_bounds = array<i64: 1, 64>}, {transform_indices = @transform_3, window_bounds = array<i64: 16, 64>}]} {
    %c0_i32 = arith.constant 0 : i32
    %0 = arith.cmpi eq, %arg2, %c0_i32 : i32
    %1 = arith.extui %0 : i1 to i32
    %c0_i32_0 = arith.constant 0 : i32
    %2 = arith.cmpi ne, %1, %c0_i32_0 : i32
    scf.if %2 {
      %cst_10 = arith.constant 0.000000e+00 : f32
      %13 = vector.broadcast %cst_10 : f32 to vector<16x64xf32>
      %c0_11 = arith.constant 0 : index
      %c0_12 = arith.constant 0 : index
      %14 = vector.load %arg7[%c0_11, %c0_12] : memref<16x64xf32, #tpu.memory_space<vmem>>, vector<16x64xf32>
      tpu.vector_store %arg7[%c0_11, %c0_12], %13 {strides = array<i32>} : memref<16x64xf32, #tpu.memory_space<vmem>>, vector<16x64xf32>,
    } else {
    }
    %c0 = arith.constant 0 : index
    %c0_1 = arith.constant 0 : index
    %3 = vector.load %arg7[%c0, %c0_1] : memref<16x64xf32, #tpu.memory_space<vmem>>, vector<16x64xf32>
    %c0_2 = arith.constant 0 : index
    %c0_3 = arith.constant 0 : index
    %4 = vector.load %arg3[%c0_2, %c0_3] : memref<16x32xf32, #tpu.memory_space<vmem>>, vector<16x32xf32>
    %5 = arith.truncf %4 : vector<16x32xf32> to vector<16x32xbf16>
    %c0_4 = arith.constant 0 : index
    %c0_5 = arith.constant 0 : index
    %6 = vector.load %arg4[%c0_4, %c0_5] : memref<64x32xbf16, #tpu.memory_space<vmem>>, vector<64x32xbf16>
    %cst = arith.constant dense<0.000000e+00> : vector<16x64xf32>
    %7 = tpu.matmul %5, %6, %cst {dimension_numbers = #tpu.dot_dimension_numbers<[1], [1], [0], [0], [0, 0, 1, 0], [], []>} : vector<16x32xbf16>, vector<64x32xbf16>, vector<16x64xf32> -> vector<16x64xf32>
    %8 = arith.addf %3, %7 : vector<16x64xf32>
    %c0_6 = arith.constant 0 : index
    %c0_7 = arith.constant 0 : index
    %9 = vector.load %arg7[%c0_6, %c0_7] : memref<16x64xf32, #tpu.memory_space<vmem>>, vector<16x64xf32>
    tpu.vector_store %arg7[%c0_6, %c0_7], %8 {strides = array<i32>} : memref<16x64xf32, #tpu.memory_space<vmem>>, vector<16x64xf32>,
    %c0_i32_8 = arith.constant 0 : i32
    %10 = arith.cmpi eq, %arg2, %c0_i32_8 : i32
    %11 = arith.extui %10 : i1 to i32
    %c0_i32_9 = arith.constant 0 : i32
    %12 = arith.cmpi ne, %11, %c0_i32_9 : i32
    scf.if %12 {
      %c0_10 = arith.constant 0 : index
      %c0_11 = arith.constant 0 : index
      %13 = vector.load %arg7[%c0_10, %c0_11] : memref<16x64xf32, #tpu.memory_space<vmem>>, vector<16x64xf32>
      %c0_12 = arith.constant 0 : index
      %c0_13 = arith.constant 0 : index
      %14 = vector.load %arg5[%c0_12, %c0_13] : memref<1x64xf32, #tpu.memory_space<vmem>>, vector<1x64xf32>
      %15 = vector.broadcast %14 : vector<1x64xf32> to vector<16x64xf32>
      %16 = arith.addf %13, %15 : vector<16x64xf32>
      %cst_14 = arith.constant 2.500000e-01 : f32
      %17 = vector.broadcast %cst_14 : f32 to vector<16x64xf32>
      %18 = arith.mulf %16, %17 : vector<16x64xf32>
      %19 = arith.truncf %18 : vector<16x64xf32> to vector<16x64xbf16>
      %c0_15 = arith.constant 0 : index
      %c0_16 = arith.constant 0 : index
      %20 = vector.load %arg6[%c0_15, %c0_16] : memref<16x64xbf16, #tpu.memory_space<vmem>>, vector<16x64xbf16>
      tpu.vector_store %arg6[%c0_15, %c0_16], %19 {strides = array<i32>} : memref<16x64xbf16, #tpu.memory_space<vmem>>, vector<16x64xbf16>,
    } else {
    }
    return
  }
  func.func @transform_0(%arg0: i32, %arg1: i32, %arg2: i32) -> (i32, i32) {
    %c0_i32 = arith.constant 0 : i32
    return %arg0, %arg2 : i32, i32
  }
  func.func @transform_1(%arg0: i32, %arg1: i32, %arg2: i32) -> (i32, i32) {
    %c0_i32 = arith.constant 0 : i32
    return %arg1, %arg2 : i32, i32
  }
  func.func @transform_2(%arg0: i32, %arg1: i32, %arg2: i32) -> (i32, i32) {
    %c0_i32 = arith.constant 0 : i32
    %c0_i32_0 = arith.constant 0 : i32
    return %c0_i32, %arg1 : i32, i32
  }
  func.func @transform_3(%arg0: i32, %arg1: i32, %arg2: i32) -> (i32, i32) {
    %c0_i32 = arith.constant 0 : i32
    return %arg0, %arg1 : i32, i32
  }
}

module attributes {stable_mosaic.version = 11 : i64} {
  func.func @_linear_kernel(%arg0: i32, %arg1: i32, %arg2: i32, %arg3: memref<16x32xf32, #tpu.memory_space<vmem>>, %arg4: memref<64x32xbf16, #tpu.memory_space<vmem>>, %arg5: memref<1x64xf32, #tpu.memory_space<vmem>>, %arg6: memref<16x64xbf16, #tpu.memory_space<vmem>>, %arg7: memref<16x64xf32, #tpu.memory_space<vmem>>) attributes {dimension_semantics = [#tpu.dimension_semantics<parallel>, #tpu.dimension_semantics<parallel>, #tpu.dimension_semantics<arbitrary>], iteration_bounds = array<i64: 1, 1, 1>, scalar_prefetch = 0 : i64, scratch_operands = 1 : i64, tpu.core_type = #tpu.core_type<tc>, window_params = [{transform_indices = @transform_0, window_bounds = array<i64: 16, 32>}, {transform_indices = @transform_1, window_bounds = array<i64: 64, 32>}, {transform_indices = @transform_2, window_bounds = array<i64: 1, 64>}, {transform_indices = @transform_3, window_bounds = array<i64: 16, 64>}]} {
    %c0_i32 = arith.constant 0 : i32
    %0 = arith.cmpi eq, %arg2, %c0_i32 : i32
    %1 = arith.extui %0 : i1 to i32
    %c0_i32_0 = arith.constant 0 : i32
    %2 = arith.cmpi ne, %1, %c0_i32_0 : i32
    scf.if %2 {
      %cst_10 = arith.constant 0.000000e+00 : f32
      %13 = vector.broadcast %cst_10 : f32 to vector<16x64xf32>
      %c0_11 = arith.constant 0 : index
      %c0_12 = arith.constant 0 : index
      %14 = vector.load %arg7[%c0_11, %c0_12] : memref<16x64xf32, #tpu.memory_space<vmem>>, vector<16x64xf32>
      tpu.vector_store %arg7[%c0_11, %c0_12], %13 {strides = array<i32>} : memref<16x64xf32, #tpu.memory_space<vmem>>, vector<16x64xf32>,
    } else {
    }
    %c0 = arith.constant 0 : index
    %c0_1 = arith.constant 0 : index
    %3 = vector.load %arg7[%c0, %c0_1] : memref<16x64xf32, #tpu.memory_space<vmem>>, vector<16x64xf32>
    %c0_2 = arith.constant 0 : index
    %c0_3 = arith.constant 0 : index
    %4 = vector.load %arg3[%c0_2, %c0_3] : memref<16x32xf32, #tpu.memory_space<vmem>>, vector<16x32xf32>
    %5 = arith.truncf %4 : vector<16x32xf32> to vector<16x32xbf16>
    %c0_4 = arith.constant 0 : index
    %c0_5 = arith.constant 0 : index
    %6 = vector.load %arg4[%c0_4, %c0_5] : memref<64x32xbf16, #tpu.memory_space<vmem>>, vector<64x32xbf16>
    %cst = arith.constant dense<0.000000e+00> : vector<16x64xf32>
    %7 = tpu.matmul %5, %6, %cst {dimension_numbers = #tpu.dot_dimension_numbers<[1], [1], [0], [0], [0, 0, 1, 0], [], []>} : vector<16x32xbf16>, vector<64x32xbf16>, vector<16x64xf32> -> vector<16x64xf32>
    %8 = arith.addf %3, %7 : vector<16x64xf32>
    %c0_6 = arith.constant 0 : index
    %c0_7 = arith.constant 0 : index
    %9 = vector.load %arg7[%c0_6, %c0_7] : memref<16x64xf32, #tpu.memory_space<vmem>>, vector<16x64xf32>
    tpu.vector_store %arg7[%c0_6, %c0_7], %8 {strides = array<i32>} : memref<16x64xf32, #tpu.memory_space<vmem>>, vector<16x64xf32>,
    %c0_i32_8 = arith.constant 0 : i32
    %10 = arith.cmpi eq, %arg2, %c0_i32_8 : i32
    %11 = arith.extui %10 : i1 to i32
    %c0_i32_9 = arith.constant 0 : i32
    %12 = arith.cmpi ne, %11, %c0_i32_9 : i32
    scf.if %12 {
      %c0_10 = arith.constant 0 : index
      %c0_11 = arith.constant 0 : index
      %13 = vector.load %arg7[%c0_10, %c0_11] : memref<16x64xf32, #tpu.memory_space<vmem>>, vector<16x64xf32>
      %c0_12 = arith.constant 0 : index
      %c0_13 = arith.constant 0 : index
      %14 = vector.load %arg5[%c0_12, %c0_13] : memref<1x64xf32, #tpu.memory_space<vmem>>, vector<1x64xf32>
      %15 = vector.broadcast %14 : vector<1x64xf32> to vector<16x64xf32>
      %16 = arith.addf %13, %15 : vector<16x64xf32>
      %17 = arith.truncf %16 : vector<16x64xf32> to vector<16x64xbf16>
      %c0_14 = arith.constant 0 : index
      %c0_15 = arith.constant 0 : index
      %18 = vector.load %arg6[%c0_14, %c0_15] : memref<16x64xbf16, #tpu.memory_space<vmem>>, vector<16x64xbf16>
      tpu.vector_store %arg6[%c0_14, %c0_15], %17 {strides = array<i32>} : memref<16x64xbf16, #tpu.memory_space<vmem>>, vector<16x64xbf16>,
    } else {
    }
    return
  }
  func.func @transform_0(%arg0: i32, %arg1: i32, %arg2: i32) -> (i32, i32) {
    %c0_i32 = arith.constant 0 : i32
    return %arg0, %arg2 : i32, i32
  }
  func.func @transform_1(%arg0: i32, %arg1: i32, %arg2: i32) -> (i32, i32) {
    %c0_i32 = arith.constant 0 : i32
    return %arg1, %arg2 : i32, i32
  }
  func.func @transform_2(%arg0: i32, %arg1: i32, %arg2: i32) -> (i32, i32) {
    %c0_i32 = arith.constant 0 : i32
    %c0_i32_0 = arith.constant 0 : i32
    return %c0_i32, %arg1 : i32, i32
  }
  func.func @transform_3(%arg0: i32, %arg1: i32, %arg2: i32) -> (i32, i32) {
    %c0_i32 = arith.constant 0 : i32
    return %arg0, %arg1 : i32, i32
  }
}

module attributes {stable_mosaic.version = 11 : i64} {
  func.func @_mha_fco_kernel(%arg0: i32, %arg1: memref<1x8x64xbf16, #tpu.memory_space<vmem>>, %arg2: memref<1x8x64xbf16, #tpu.memory_space<vmem>>, %arg3: memref<1x8x64xbf16, #tpu.memory_space<vmem>>, %arg4: memref<32x64xbf16, #tpu.memory_space<vmem>>, %arg5: memref<1x32xf32, #tpu.memory_space<vmem>>, %arg6: memref<1x8x32xf32, #tpu.memory_space<vmem>>, %arg7: memref<8x64xf32, #tpu.memory_space<vmem>>) attributes {dimension_semantics = [#tpu.dimension_semantics<parallel>], iteration_bounds = array<i64: 2>, scalar_prefetch = 0 : i64, scratch_operands = 1 : i64, tpu.core_type = #tpu.core_type<tc>, window_params = [{transform_indices = @transform_0, window_bounds = array<i64: 1, 8, 64>}, {transform_indices = @transform_1, window_bounds = array<i64: 1, 8, 64>}, {transform_indices = @transform_2, window_bounds = array<i64: 1, 8, 64>}, {pipeline_mode = #tpu.pipeline_mode<synchronous>, transform_indices = @transform_3, window_bounds = array<i64: 32, 64>}, {pipeline_mode = #tpu.pipeline_mode<synchronous>, transform_indices = @transform_4, window_bounds = array<i64: 1, 32>}, {transform_indices = @transform_5, window_bounds = array<i64: 1, 8, 32>}]} {
    %c0 = arith.constant 0 : index
    %c0_0 = arith.constant 0 : index
    %c0_1 = arith.constant 0 : index
    %0 = vector.load %arg1[%c0, %c0_0, %c0_1] : memref<1x8x64xbf16, #tpu.memory_space<vmem>>, vector<1x8x16xbf16>
    %1 = vector.shape_cast %0 : vector<1x8x16xbf16> to vector<8x16xbf16>
    %c0_2 = arith.constant 0 : index
    %c0_3 = arith.constant 0 : index
    %c0_4 = arith.constant 0 : index
    %2 = vector.load %arg2[%c0_2, %c0_3, %c0_4] : memref<1x8x64xbf16, #tpu.memory_space<vmem>>, vector<1x8x16xbf16>
    %3 = vector.shape_cast %2 : vector<1x8x16xbf16> to vector<8x16xbf16>
    %c0_5 = arith.constant 0 : index
    %c0_6 = arith.constant 0 : index
    %c0_7 = arith.constant 0 : index
    %4 = vector.load %arg3[%c0_5, %c0_6, %c0_7] : memref<1x8x64xbf16, #tpu.memory_space<vmem>>, vector<1x8x16xbf16>
    %5 = vector.shape_cast %4 : vector<1x8x16xbf16> to vector<8x16xbf16>
    %cst = arith.constant dense<0.000000e+00> : vector<8x8xf32>
    %6 = tpu.matmul %1, %3, %cst {dimension_numbers = #tpu.dot_dimension_numbers<[1], [1], [0], [0], [0, 0, 1, 0], [], []>} : vector<8x16xbf16>, vector<8x16xbf16>, vector<8x8xf32> -> vector<8x8xf32>
    %cst_8 = arith.constant dense<0xFF800000> : vector<8xf32>
    %7 = vector.multi_reduction <maximumf>, %6, %cst_8 [1] : vector<8x8xf32> to vector<8xf32>
    %8 = vector.shape_cast %7 : vector<8xf32> to vector<8x1xf32>
    %9 = vector.broadcast %8 : vector<8x1xf32> to vector<8x8xf32>
    %10 = arith.subf %6, %9 : vector<8x8xf32>
    %11 = math.exp %10 : vector<8x8xf32>
    %cst_9 = arith.constant dense<0.000000e+00> : vector<8xf32>
    %12 = vector.multi_reduction <add>, %11, %cst_9 [1] : vector<8x8xf32> to vector<8xf32>
    %13 = vector.shape_cast %12 : vector<8xf32> to vector<8x1xf32>
    %14 = tpu.reciprocal %13 {approx = true} : vector<8x1xf32> -> vector<8x1xf32>
    %15 = arith.truncf %11 : vector<8x8xf32> to vector<8x8xbf16>
    %cst_10 = arith.constant dense<0.000000e+00> : vector<8x16xf32>
    %16 = tpu.matmul %15, %5, %cst_10 {dimension_numbers = #tpu.dot_dimension_numbers<[1], [0], [0], [1], [0, 0, 1, 1], [], []>} : vector<8x8xbf16>, vector<8x16xbf16>, vector<8x16xf32> -> vector<8x16xf32>
    %17 = vector.broadcast %14 : vector<8x1xf32> to vector<8x16xf32>
    %18 = arith.mulf %16, %17 : vector<8x16xf32>
    %c0_11 = arith.constant 0 : index
    %c0_12 = arith.constant 0 : index
    %19 = vector.load %arg7[%c0_11, %c0_12] : memref<8x64xf32, #tpu.memory_space<vmem>>, vector<8x16xf32>
    tpu.vector_store %arg7[%c0_11, %c0_12], %18 {strides = array<i32>} : memref<8x64xf32, #tpu.memory_space<vmem>>, vector<8x16xf32>,
    %c0_13 = arith.constant 0 : index
    %c0_14 = arith.constant 0 : index
    %c16 = arith.constant 16 : index
    %20 = vector.load %arg1[%c0_13, %c0_14, %c16] : memref<1x8x64xbf16, #tpu.memory_space<vmem>>, vector<1x8x16xbf16>
    %21 = vector.shape_cast %20 : vector<1x8x16xbf16> to vector<8x16xbf16>
    %c0_15 = arith.constant 0 : index
    %c0_16 = arith.constant 0 : index
    %c16_17 = arith.constant 16 : index
    %22 = vector.load %arg2[%c0_15, %c0_16, %c16_17] : memref<1x8x64xbf16, #tpu.memory_space<vmem>>, vector<1x8x16xbf16>
    %23 = vector.shape_cast %22 : vector<1x8x16xbf16> to vector<8x16xbf16>
    %c0_18 = arith.constant 0 : index
    %c0_19 = arith.constant 0 : index
    %c16_20 = arith.constant 16 : index
    %24 = vector.load %arg3[%c0_18, %c0_19, %c16_20] : memref<1x8x64xbf16, #tpu.memory_space<vmem>>, vector<1x8x16xbf16>
    %25 = vector.shape_cast %24 : vector<1x8x16xbf16> to vector<8x16xbf16>
    %cst_21 = arith.constant dense<0.000000e+00> : vector<8x8xf32>
    %26 = tpu.matmul %21, %23, %cst_21 {dimension_numbers = #tpu.dot_dimension_numbers<[1], [1], [0], [0], [0, 0, 1, 0], [], []>} : vector<8x16xbf16>, vector<8x16xbf16>, vector<8x8xf32> -> vector<8x8xf32>
    %cst_22 = arith.constant dense<0xFF800000> : vector<8xf32>
    %27 = vector.multi_reduction <maximumf>, %26, %cst_22 [1] : vector<8x8xf32> to vector<8xf32>
    %28 = vector.shape_cast %27 : vector<8xf32> to vector<8x1xf32>
    %29 = vector.broadcast %28 : vector<8x1xf32> to vector<8x8xf32>
    %30 = arith.subf %26, %29 : vector<8x8xf32>
    %31 = math.exp %30 : vector<8x8xf32>
    %cst_23 = arith.constant dense<0.000000e+00> : vector<8xf32>
    %32 = vector.multi_reduction <add>, %31, %cst_23 [1] : vector<8x8xf32> to vector<8xf32>
    %33 = vector.shape_cast %32 : vector<8xf32> to vector<8x1xf32>
    %34 = tpu.reciprocal %33 {approx = true} : vector<8x1xf32> -> vector<8x1xf32>
    %35 = arith.truncf %31 : vector<8x8xf32> to vector<8x8xbf16>
    %cst_24 = arith.constant dense<0.000000e+00> : vector<8x16xf32>
    %36 = tpu.matmul %35, %25, %cst_24 {dimension_numbers = #tpu.dot_dimension_numbers<[1], [0], [0], [1], [0, 0, 1, 1], [], []>} : vector<8x8xbf16>, vector<8x16xbf16>, vector<8x16xf32> -> vector<8x16xf32>
    %37 = vector.broadcast %34 : vector<8x1xf32> to vector<8x16xf32>
    %38 = arith.mulf %36, %37 : vector<8x16xf32>
    %c0_25 = arith.constant 0 : index
    %c16_26 = arith.constant 16 : index
    %39 = vector.load %arg7[%c0_25, %c16_26] : memref<8x64xf32, #tpu.memory_space<vmem>>, vector<8x16xf32>
    tpu.vector_store %arg7[%c0_25, %c16_26], %38 {strides = array<i32>} : memref<8x64xf32, #tpu.memory_space<vmem>>, vector<8x16xf32>,
    %c0_27 = arith.constant 0 : index
    %c0_28 = arith.constant 0 : index
    %c32 = arith.constant 32 : index
    %40 = vector.load %arg1[%c0_27, %c0_28, %c32] : memref<1x8x64xbf16, #tpu.memory_space<vmem>>, vector<1x8x16xbf16>
    %41 = vector.shape_cast %40 : vector<1x8x16xbf16> to vector<8x16xbf16>
    %c0_29 = arith.constant 0 : index
    %c0_30 = arith.constant 0 : index
    %c32_31 = arith.constant 32 : index
    %42 = vector.load %arg2[%c0_29, %c0_30, %c32_31] : memref<1x8x64xbf16, #tpu.memory_space<vmem>>, vector<1x8x16xbf16>
    %43 = vector.shape_cast %42 : vector<1x8x16xbf16> to vector<8x16xbf16>
    %c0_32 = arith.constant 0 : index
    %c0_33 = arith.constant 0 : index
    %c32_34 = arith.constant 32 : index
    %44 = vector.load %arg3[%c0_32, %c0_33, %c32_34] : memref<1x8x64xbf16, #tpu.memory_space<vmem>>, vector<1x8x16xbf16>
    %45 = vector.shape_cast %44 : vector<1x8x16xbf16> to vector<8x16xbf16>
    %cst_35 = arith.constant dense<0.000000e+00> : vector<8x8xf32>
    %46 = tpu.matmul %41, %43, %cst_35 {dimension_numbers = #tpu.dot_dimension_numbers<[1], [1], [0], [0], [0, 0, 1, 0], [], []>} : vector<8x16xbf16>, vector<8x16xbf16>, vector<8x8xf32> -> vector<8x8xf32>
    %cst_36 = arith.constant dense<0xFF800000> : vector<8xf32>
    %47 = vector.multi_reduction <maximumf>, %46, %cst_36 [1] : vector<8x8xf32> to vector<8xf32>
    %48 = vector.shape_cast %47 : vector<8xf32> to vector<8x1xf32>
    %49 = vector.broadcast %48 : vector<8x1xf32> to vector<8x8xf32>
    %50 = arith.subf %46, %49 : vector<8x8xf32>
    %51 = math.exp %50 : vector<8x8xf32>
    %cst_37 = arith.constant dense<0.000000e+00> : vector<8xf32>
    %52 = vector.multi_reduction <add>, %51, %cst_37 [1] : vector<8x8xf32> to vector<8xf32>
    %53 = vector.shape_cast %52 : vector<8xf32> to vector<8x1xf32>
    %54 = tpu.reciprocal %53 {approx = true} : vector<8x1xf32> -> vector<8x1xf32>
    %55 = arith.truncf %51 : vector<8x8xf32> to vector<8x8xbf16>
    %cst_38 = arith.constant dense<0.000000e+00> : vector<8x16xf32>
    %56 = tpu.matmul %55, %45, %cst_38 {dimension_numbers = #tpu.dot_dimension_numbers<[1], [0], [0], [1], [0, 0, 1, 1], [], []>} : vector<8x8xbf16>, vector<8x16xbf16>, vector<8x16xf32> -> vector<8x16xf32>
    %57 = vector.broadcast %54 : vector<8x1xf32> to vector<8x16xf32>
    %58 = arith.mulf %56, %57 : vector<8x16xf32>
    %c0_39 = arith.constant 0 : index
    %c32_40 = arith.constant 32 : index
    %59 = vector.load %arg7[%c0_39, %c32_40] : memref<8x64xf32, #tpu.memory_space<vmem>>, vector<8x16xf32>
    tpu.vector_store %arg7[%c0_39, %c32_40], %58 {strides = array<i32>} : memref<8x64xf32, #tpu.memory_space<vmem>>, vector<8x16xf32>,
    %c0_41 = arith.constant 0 : index
    %c0_42 = arith.constant 0 : index
    %c48 = arith.constant 48 : index
    %60 = vector.load %arg1[%c0_41, %c0_42, %c48] : memref<1x8x64xbf16, #tpu.memory_space<vmem>>, vector<1x8x16xbf16>
    %61 = vector.shape_cast %60 : vector<1x8x16xbf16> to vector<8x16xbf16>
    %c0_43 = arith.constant 0 : index
    %c0_44 = arith.constant 0 : index
    %c48_45 = arith.constant 48 : index
    %62 = vector.load %arg2[%c0_43, %c0_44, %c48_45] : memref<1x8x64xbf16, #tpu.memory_space<vmem>>, vector<1x8x16xbf16>
    %63 = vector.shape_cast %62 : vector<1x8x16xbf16> to vector<8x16xbf16>
    %c0_46 = arith.constant 0 : index
    %c0_47 = arith.constant 0 : index
    %c48_48 = arith.constant 48 : index
    %64 = vector.load %arg3[%c0_46, %c0_47, %c48_48] : memref<1x8x64xbf16, #tpu.memory_space<vmem>>, vector<1x8x16xbf16>
    %65 = vector.shape_cast %64 : vector<1x8x16xbf16> to vector<8x16xbf16>
    %cst_49 = arith.constant dense<0.000000e+00> : vector<8x8xf32>
    %66 = tpu.matmul %61, %63, %cst_49 {dimension_numbers = #tpu.dot_dimension_numbers<[1], [1], [0], [0], [0, 0, 1, 0], [], []>} : vector<8x16xbf16>, vector<8x16xbf16>, vector<8x8xf32> -> vector<8x8xf32>
    %cst_50 = arith.constant dense<0xFF800000> : vector<8xf32>
    %67 = vector.multi_reduction <maximumf>, %66, %cst_50 [1] : vector<8x8xf32> to vector<8xf32>
    %68 = vector.shape_cast %67 : vector<8xf32> to vector<8x1xf32>
    %69 = vector.broadcast %68 : vector<8x1xf32> to vector<8x8xf32>
    %70 = arith.subf %66, %69 : vector<8x8xf32>
    %71 = math.exp %70 : vector<8x8xf32>
    %cst_51 = arith.constant dense<0.000000e+00> : vector<8xf32>
    %72 = vector.multi_reduction <add>, %71, %cst_51 [1] : vector<8x8xf32> to vector<8xf32>
    %73 = vector.shape_cast %72 : vector<8xf32> to vector<8x1xf32>
    %74 = tpu.reciprocal %73 {approx = true} : vector<8x1xf32> -> vector<8x1xf32>
    %75 = arith.truncf %71 : vector<8x8xf32> to vector<8x8xbf16>
    %cst_52 = arith.constant dense<0.000000e+00> : vector<8x16xf32>
    %76 = tpu.matmul %75, %65, %cst_52 {dimension_numbers = #tpu.dot_dimension_numbers<[1], [0], [0], [1], [0, 0, 1, 1], [], []>} : vector<8x8xbf16>, vector<8x16xbf16>, vector<8x16xf32> -> vector<8x16xf32>
    %77 = vector.broadcast %74 : vector<8x1xf32> to vector<8x16xf32>
    %78 = arith.mulf %76, %77 : vector<8x16xf32>
    %c0_53 = arith.constant 0 : index
    %c48_54 = arith.constant 48 : index
    %79 = vector.load %arg7[%c0_53, %c48_54] : memref<8x64xf32, #tpu.memory_space<vmem>>, vector<8x16xf32>
    tpu.vector_store %arg7[%c0_53, %c48_54], %78 {strides = array<i32>} : memref<8x64xf32, #tpu.memory_space<vmem>>, vector<8x16xf32>,
    %c0_55 = arith.constant 0 : index
    %c0_56 = arith.constant 0 : index
    %80 = vector.load %arg7[%c0_55, %c0_56] : memref<8x64xf32, #tpu.memory_space<vmem>>, vector<8x64xf32>
    %81 = arith.truncf %80 : vector<8x64xf32> to vector<8x64xbf16>
    %c0_57 = arith.constant 0 : index
    %c0_58 = arith.constant 0 : index
    %82 = vector.load %arg4[%c0_57, %c0_58] : memref<32x64xbf16, #tpu.memory_space<vmem>>, vector<32x64xbf16>
    %cst_59 = arith.constant dense<0.000000e+00> : vector<8x32xf32>
    %83 = tpu.matmul %81, %82, %cst_59 {dimension_numbers = #tpu.dot_dimension_numbers<[1], [1], [0], [0], [0, 0, 1, 0], [], []>} : vector<8x64xbf16>, vector<32x64xbf16>, vector<8x32xf32> -> vector<8x32xf32>
    %c0_60 = arith.constant 0 : index
    %c0_61 = arith.constant 0 : index
    %84 = vector.load %arg5[%c0_60, %c0_61] : memref<1x32xf32, #tpu.memory_space<vmem>>, vector<1x32xf32>
    %85 = vector.broadcast %84 : vector<1x32xf32> to vector<8x32xf32>
    %86 = arith.addf %83, %85 : vector<8x32xf32>
    %c0_62 = arith.constant 0 : index
    %c0_63 = arith.constant 0 : index
    %c0_64 = arith.constant 0 : index
    %87 = vector.load %arg6[%c0_62, %c0_63, %c0_64] : memref<1x8x32xf32, #tpu.memory_space<vmem>>, vector<1x8x32xf32>
    %88 = vector.shape_cast %87 : vector<1x8x32xf32> to vector<8x32xf32>
    %89 = vector.shape_cast %86 : vector<8x32xf32> to vector<1x8x32xf32>
    tpu.vector_store %arg6[%c0_62, %c0_63, %c0_64], %89 {strides = array<i32>} : memref<1x8x32xf32, #tpu.memory_space<vmem>>, vector<1x8x32xf32>,
    return
  }
  func.func @transform_0(%arg0: i32) -> (i32, i32, i32) {
    %c0_i32 = arith.constant 0 : i32
    %c0_i32_0 = arith.constant 0 : i32
    %c0_i32_1 = arith.constant 0 : i32
    return %arg0, %c0_i32, %c0_i32_0 : i32, i32, i32
  }
  func.func @transform_1(%arg0: i32) -> (i32, i32, i32) {
    %c0_i32 = arith.constant 0 : i32
    %c0_i32_0 = arith.constant 0 : i32
    %c0_i32_1 = arith.constant 0 : i32
    return %arg0, %c0_i32, %c0_i32_0 : i32, i32, i32
  }
  func.func @transform_2(%arg0: i32) -> (i32, i32, i32) {
    %c0_i32 = arith.constant 0 : i32
    %c0_i32_0 = arith.constant 0 : i32
    %c0_i32_1 = arith.constant 0 : i32
    return %arg0, %c0_i32, %c0_i32_0 : i32, i32, i32
  }
  func.func @transform_3(%arg0: i32) -> (i32, i32) {
    %c0_i32 = arith.constant 0 : i32
    %c0_i32_0 = arith.constant 0 : i32
    %c0_i32_1 = arith.constant 0 : i32
    return %c0_i32, %c0_i32_0 : i32, i32
  }
  func.func @transform_4(%arg0: i32) -> (i32, i32) {
    %c0_i32 = arith.constant 0 : i32
    %c0_i32_0 = arith.constant 0 : i32
    %c0_i32_1 = arith.constant 0 : i32
    return %c0_i32, %c0_i32_0 : i32, i32
  }
  func.func @transform_5(%arg0: i32) -> (i32, i32, i32) {
    %c0_i32 = arith.constant 0 : i32
    %c0_i32_0 = arith.constant 0 : i32
    %c0_i32_1 = arith.constant 0 : i32
    return %arg0, %c0_i32, %c0_i32_0 : i32, i32, i32
  }
}

</mosaic_0001>

<bundles_post_ra>
// kernel: scaled_dot_product_attention.4
= control target key start
LH: loop header
LB: loop body
LE: loop exit
PB: predicated region body
PF: predicated region fallthrough
CT: control target
= control target key end

     0   :  { %vm55_vm0 = vcmask 261120   ;;  %vm19_vm1 = vcmask 523264   ;;  %v181_v0 = vmov 0.0   ;;  %vm182_vm2 = vmmov 0   ;;  %s239_s1 = inlined_call_operand.vmem [shape: bf16[64,32], index: 1, kind: input, shape index: {}]   ;;  %s240_s0 = inlined_call_operand.vmem [shape: f32[16,32], index: 0, kind: input, shape index: {}]   ;;  %s241_s2 = inlined_call_operand.vmem [shape: f32[1,64], index: 2, kind: input, shape index: {}]   ;;  %s242_s3 = inlined_call_operand.vmem [shape: bf16[16,64], index: 3, kind: output, shape index: {}]  }
   0x1   :  { %163 = vmatprep.subr.bf16.mxu0 %v181_v0  ;;  %v177_v1 = vld [vmem:[%s239_s1 + $0x18] sm:$0xff]   ;;  %171 = vmatprep.mubr.msk.bf16.mxu0 %vm182_vm2, %v181_v0  ;;  %20 = vst.msk [vmem:[#allocation2] sm:$0xff] %vm19_vm1, %v181_v0  ;;  %21 = vst.msk [vmem:[#allocation2 + $0x8] sm:$0xff] %vm19_vm1, %v181_v0  ;;  %v178_v3 = vld [vmem:[%s239_s1 + $0x10] sm:$0xff]   ;;  %vm141_vm3 = vcmask 519168  }
   0x2   :  { %v69_v2 = vsel %vm55_vm0, %v177_v1, 0  ;;  %v66_v4 = vsel %vm55_vm0, %v178_v3, 0  ;;  %v179_v5 = vld [vmem:[%s239_s1 + $0x8] sm:$0xff]   ;;  %v180_v7 = vld [vmem:[%s239_s1] sm:$0xff]  }
   0x3   :  { %164 = vmatpush3.bf16.xpose.msra.mxu0 %v69_v2  ;;  %v63_v6 = vsel %vm55_vm0, %v179_v5, 0  ;;  %v60_v8 = vsel %vm55_vm0, %v180_v7, 0  ;;  %v24_v9 = vld [vmem:[%s240_s0] sm:$0xff]  ;;  %v25_v10 = vld [vmem:[%s240_s0 + $0x8] sm:$0xff] }
   0x4   :  { %165 = vmatprep.subr.bf16.mxu0 %v181_v0  ;;  %v26_v11 = vpack.c.bf16 %v25_v10, %v24_v9  ;;  %v153_v20 = vld [vmem:[%s241_s2] ss:$0 sm:$0xff] }
   0x8   :  { %v22_v12 = vld [vmem:[#allocation2] sm:$0xff]  ;;  %v23_v16 = vld [vmem:[#allocation2 + $0x8] sm:$0xff] }
   0xb   :  { %166 = vmatpush3.bf16.xpose.msra.mxu0 %v66_v4 }
   0xc   :  { %167 = vmatprep.subr.bf16.mxu0 %v181_v0 }
  0x13   :  { %168 = vmatpush3.bf16.xpose.msra.mxu0 %v63_v6 }
  0x14   :  { %169 = vmatprep.subr.bf16.mxu0 %v181_v0 }
  0x1b   :  { %170 = vmatpush3.bf16.xpose.msra.mxu0 %v60_v8 }
  0x22   :  { %172 = vmatmul.mubr.msk.bf16.vlgmr.msra.gmra.mxu0 %vm55_vm0, %v26_v11 }
  0xe2   :  { %v105_v13 = vpop.f32.mrf.mxu0 }
  0xe3   :  { %v112_v14 = vadd.f32 %v105_v13, %v22_v12 }
  0xe4   :  { %v173_v15 = vpop.f32.mrf.mxu0 }
  0xe5   :  { %115 = vst.msk [vmem:[#allocation2] sm:$0xff] %vm19_vm1, %v112_v14 }
  0xe6   :  { %v108_v17 = vpop.f32.mrf.mxu0 }
  0xe7   :  { %v113_v18 = vadd.f32 %v108_v17, %v23_v16 }
  0xe8   :  { %v174_v19 = vpop.f32.mrf.mxu0 }
  0xe9   :  { %116 = vst.msk [vmem:[#allocation2 + $0x8] sm:$0xff] %vm19_vm1, %v113_v18 }
  0xec   :  { %v120_v21 = vld [vmem:[#allocation2] sm:$0xff] }
  0xed   :  { %v129_v22 = vadd.f32 %v153_v20, %v120_v21 }
  0xef   :  { %v131_v23 = vmul.f32 0.25, %v129_v22 }
  0xf0   :  { %v121_v24 = vld [vmem:[#allocation2 + $0x8] sm:$0xff] }
  0xf1   :  { %v156_v25 = vpack.c.bf16 %v131_v23, %v131_v23  ;;  %v130_v26 = vadd.f32 %v153_v20, %v121_v24 }
  0xf3   :  { %142 = vst.msk [vmem:[%s242_s3] sm:$0xf] %vm141_vm3, %v156_v25  ;;  %v132_v27 = vmul.f32 0.25, %v130_v26 }
  0xf5   :  { %v157_v28 = vpack.c.bf16 %v132_v27, %v132_v27 }
  0xf7   :  { %143 = vst.msk [vmem:[%s242_s3 + $0x4] sm:$0xf] %vm141_vm3, %v157_v28 }

// kernel: scaled_dot_product_attention.5
= control target key start
LH: loop header
LB: loop body
LE: loop exit
PB: predicated region body
PF: predicated region fallthrough
CT: control target
= control target key end

     0   :  { %vm55_vm0 = vcmask 261120   ;;  %vm19_vm1 = vcmask 523264   ;;  %v179_v0 = vmov 0.0   ;;  %vm180_vm2 = vmmov 0   ;;  %s237_s1 = inlined_call_operand.vmem [shape: bf16[64,32], index: 1, kind: input, shape index: {}]   ;;  %s238_s0 = inlined_call_operand.vmem [shape: f32[16,32], index: 0, kind: input, shape index: {}]   ;;  %s239_s2 = inlined_call_operand.vmem [shape: f32[1,64], index: 2, kind: input, shape index: {}]   ;;  %s240_s3 = inlined_call_operand.vmem [shape: bf16[16,64], index: 3, kind: output, shape index: {}]  }
   0x1   :  { %161 = vmatprep.subr.bf16.mxu0 %v179_v0  ;;  %v175_v1 = vld [vmem:[%s237_s1 + $0x18] sm:$0xff]   ;;  %169 = vmatprep.mubr.msk.bf16.mxu0 %vm180_vm2, %v179_v0  ;;  %20 = vst.msk [vmem:[#allocation2] sm:$0xff] %vm19_vm1, %v179_v0  ;;  %21 = vst.msk [vmem:[#allocation2 + $0x8] sm:$0xff] %vm19_vm1, %v179_v0  ;;  %v176_v3 = vld [vmem:[%s237_s1 + $0x10] sm:$0xff]   ;;  %vm139_vm3 = vcmask 519168  }
   0x2   :  { %v69_v2 = vsel %vm55_vm0, %v175_v1, 0  ;;  %v66_v4 = vsel %vm55_vm0, %v176_v3, 0  ;;  %v177_v5 = vld [vmem:[%s237_s1 + $0x8] sm:$0xff]   ;;  %v178_v7 = vld [vmem:[%s237_s1] sm:$0xff]  }
   0x3   :  { %162 = vmatpush3.bf16.xpose.msra.mxu0 %v69_v2  ;;  %v63_v6 = vsel %vm55_vm0, %v177_v5, 0  ;;  %v60_v8 = vsel %vm55_vm0, %v178_v7, 0  ;;  %v24_v9 = vld [vmem:[%s238_s0] sm:$0xff]  ;;  %v25_v10 = vld [vmem:[%s238_s0 + $0x8] sm:$0xff] }
   0x4   :  { %163 = vmatprep.subr.bf16.mxu0 %v179_v0  ;;  %v26_v11 = vpack.c.bf16 %v25_v10, %v24_v9  ;;  %v151_v20 = vld [vmem:[%s239_s2] ss:$0 sm:$0xff] }
   0x8   :  { %v22_v12 = vld [vmem:[#allocation2] sm:$0xff]  ;;  %v23_v16 = vld [vmem:[#allocation2 + $0x8] sm:$0xff] }
   0xb   :  { %164 = vmatpush3.bf16.xpose.msra.mxu0 %v66_v4 }
   0xc   :  { %165 = vmatprep.subr.bf16.mxu0 %v179_v0 }
  0x13   :  { %166 = vmatpush3.bf16.xpose.msra.mxu0 %v63_v6 }
  0x14   :  { %167 = vmatprep.subr.bf16.mxu0 %v179_v0 }
  0x1b   :  { %168 = vmatpush3.bf16.xpose.msra.mxu0 %v60_v8 }
  0x22   :  { %170 = vmatmul.mubr.msk.bf16.vlgmr.msra.gmra.mxu0 %vm55_vm0, %v26_v11 }
  0xe2   :  { %v105_v13 = vpop.f32.mrf.mxu0 }
  0xe3   :  { %v112_v14 = vadd.f32 %v105_v13, %v22_v12 }
  0xe4   :  { %v171_v15 = vpop.f32.mrf.mxu0 }
  0xe5   :  { %115 = vst.msk [vmem:[#allocation2] sm:$0xff] %vm19_vm1, %v112_v14 }
  0xe6   :  { %v108_v17 = vpop.f32.mrf.mxu0 }
  0xe7   :  { %v113_v18 = vadd.f32 %v108_v17, %v23_v16 }
  0xe8   :  { %v172_v19 = vpop.f32.mrf.mxu0 }
  0xe9   :  { %116 = vst.msk [vmem:[#allocation2 + $0x8] sm:$0xff] %vm19_vm1, %v113_v18 }
  0xec   :  { %v120_v21 = vld [vmem:[#allocation2] sm:$0xff] }
  0xed   :  { %v129_v22 = vadd.f32 %v151_v20, %v120_v21 }
  0xef   :  { %v154_v23 = vpack.c.bf16 %v129_v22, %v129_v22 }
  0xf0   :  { %v121_v24 = vld [vmem:[#allocation2 + $0x8] sm:$0xff] }
  0xf1   :  { %140 = vst.msk [vmem:[%s240_s3] sm:$0xf] %vm139_vm3, %v154_v23  ;;  %v130_v25 = vadd.f32 %v151_v20, %v121_v24 }
  0xf3   :  { %v155_v26 = vpack.c.bf16 %v130_v25, %v130_v25 }
  0xf5   :  { %141 = vst.msk [vmem:[%s240_s3 + $0x4] sm:$0xf] %vm139_vm3, %v155_v26 }

// kernel: scaled_dot_product_attention.7
= control target key start
LH: loop header
LB: loop body
LE: loop exit
PB: predicated region body
PF: predicated region fallthrough
CT: control target
= control target key end

     0   :  { %10 = vsyncpa [#allocation4], 0  ;;  %s1395_s0 = inlined_call_operand.vmem [shape: bf16[2,8,64], index: 0, kind: input, shape index: {}]   ;;  %s1396_s1 = inlined_call_operand.vmem [shape: bf16[2,8,64], index: 1, kind: input, shape index: {}]   ;;  %s1397_s2 = inlined_call_operand.vmem [shape: bf16[2,8,64], index: 2, kind: input, shape index: {}]   ;;  %s1398_s3 = inlined_call_operand.vmem [shape: bf16[32,64], index: 3, kind: input, shape index: {}]   ;;  %s1399_s4 = inlined_call_operand.vmem [shape: f32[1,32], index: 4, kind: input, shape index: {}]   ;;  %s1400_s5 = inlined_call_operand.hbm [shape: f32[2,8,32], index: 5, kind: output, shape index: {}]  }
   0x1   :  { %12 = vsyncpa [#allocation4 + $0x1], 0  ;;  %s1205_s18 = smov 0   ;;  %s1207_s19 = smov 0  }
   0x2   :  { %s1209_s20 = smov 0   ;;  %s1211_s21 = smov 0  }
   0x3 LB: > { %s1226_s22 = sadd.s32 4294967295, %s1164_s21   ;;  %s922_s23 = sadd.s32 4294967294, %s1164_s21   ;;  %s1164_s21 = sphi %s1211_s21, %s1406_s21   ;;  %s1160_s20 = sphi %s1209_s20, %s1405_s20   ;;  %s1156_s19 = sphi %s1207_s19, %s1404_s19   ;;  %s1152_s18 = sphi %s1205_s18, %s1403_s18  }
   0x4   : > { %s1230_s24 = sadd.s32 1, %s1164_s21   ;;  %s145_s25 = sadd.s32 1, %s1160_s20 }
   0x5   : > { %s142_s26 = ssub.s32 %s1164_s21, %s1230_s24  ;;  %p155_p0 = scmp.ne.s32.totalorder %s1160_s20, %s1156_s19 }
   0x6   : > { %p143_p1 = scmp.eq.s32.totalorder %s142_s26, 0  ;;  %p156_p2 = scmp.eq.s32.totalorder %s1226_s22, 1 }
   0x7   : > { %p161_p3 = scmp.ne.s32.totalorder %s1156_s19, %s1152_s18  ;;  %p162_p4 = scmp.eq.s32.totalorder %s922_s23, 1 }
   0x8   : > { %s1241_s27 = scalar_select %p143_p1, %s1160_s20, %s145_s25  }
   0x9   : > { %p1243_p5 = por %p156_p2, %p155_p0  ;;  %p1247_p6 = por %p162_p4, %p161_p3 }
   0xa   : > { %p925_p7 = scmp.ge.s32.totalorder %s1164_s21, 1  ;;  %p207_p8 = scmp.lt.s32.totalorder %s1164_s21, 3 }
   0xc   : > { %p208_p9 = pnand %p925_p7, %p207_p8 }
   0xd   : > { %p242_p10 = scmp.lt.s32.totalorder (!%p208_p9), %s1226_s22, 1  ;;  %s1168_s13 = smov (!%p208_p9), 112  }
   0xe   : > { %211 = sbr.rel (%p208_p9) target bundleno = 1045 (0x415), region = 40  ;;  %s1169_s14 = smov (!%p208_p9), 96  }
   0xf   : > { %s1170_s15 = smov (!%p208_p9), 80   ;;  %s1172_s8 = smov (!%p208_p9), 32  }
  0x10   : > { %s239_s10 = sand.u32 (!%p208_p9), 1, %s1156_s19  }
  0x11   : > { %s926_s11 = sshll.u32 (!%p208_p9), %s239_s10, 3  ;;  %s826_s26 = scalar_lea.sflag (!%p208_p9), [#allocation4], %s239_s10 }
  0x13   : > { %v1166_v0 = vmov 0.0   ;;  %vm1167_vm0 = vmmov 0   ;;  %s243_s30 = scalar_select %p242_p10, %s1226_s22, 1  ;;  %vm258_vm1 = vcmask 130048   ;;  %vm305_vm2 = vcmask 64512  }
  0x14   : > { %974 = vmatprep.subr.bf16.mxu0 %v1166_v0  ;;  %976 = vmatprep.mubr.msk.bf16.mxu0 %vm1167_vm0, %v1166_v0  ;;  %vm320_vm3 = vcmask 1043456   ;;  %vm773_vm4 = vcmask 523264   ;;  %vm492_vm5 = vcmask 261248   ;;  %vm620_vm6 = vcmask 392448  }
  0x15   : > { %986 = vmatprep.subr.bf16.mxu1 %v1166_v0  ;;  %988 = vmatprep.mubr.msk.bf16.mxu1 %vm1167_vm0, %v1166_v0  ;;  %s1261_s6 = sshll.u32 %s243_s30, 2  ;;  %s1171_s30 = smov 16   ;;  %vm748_vm7 = vcmask 523648   ;;  %vm823_vm8 = vcmask 261120  }
  0x16   : > { %s249_s9 = scalar_lea.vmem %s1396_s1, %s1261_s6  ;;  %s245_s12 = scalar_lea.vmem %s1395_s0, %s1261_s6 }
  0x17   : > { %v256_v1 = vld [vmem:[%s249_s9] sm:$0xf]  ;;  %s1302_s23 = scalar_lea.vmem %s1397_s2, %s1261_s6 }
  0x18   : > { %v1077_v2 = vld [vmem:[%s249_s9] ss:$0 sps:$4 sm:$0xff]   ;;  %v263_v3 = vsel %vm258_vm1, %v256_v1, 0 }
  0x19   : > { %975 = vmatpush3.bf16.xpose.msra.mxu0 %v263_v3  ;;  %377 = vrot.lane.b32.xlu0 %v1077_v2, %s1168_s13  ;;  %v1078_v4 = vld [vmem:[%s249_s9] ss:$0 sps:$4 sm:$0xff]  }
  0x1a   : > { %v1079_v5 = vld [vmem:[%s245_s12] ss:$0 sps:$4 sm:$0xff]   ;;  %980 = vmatprep.subr.bf16.mxu0 %v1166_v0  ;;  %505 = vrot.lane.b32.xlu1 %v1078_v4, %s1169_s14 }
  0x1b   : > { %v1080_v6 = vld [vmem:[%s245_s12] ss:$0 sps:$4 sm:$0xff]  }
  0x1c   : > { %v255_v7 = vld [vmem:[%s245_s12] sm:$0xf] }
  0x1d   : > { %372 = vrot.lane.b32.xlu0 %v1079_v5, %s1168_s13  ;;  %v1081_v8 = vld [vmem:[%s249_s9] ss:$0 sps:$4 sm:$0xff]   ;;  %s1173_s9 = smov 48  }
  0x1e   : > { %500 = vrot.lane.b32.xlu1 %v1080_v6, %s1169_s14  ;;  %v1082_v9 = vld [vmem:[%s245_s12] ss:$0 sps:$4 sm:$0xff]  }
  0x1f   : > { %v257_v24 = vld [vmem:[%s1302_s23] sm:$0xf] }
  0x20   : > { %977 = vmatmul.mubr.msk.bf16.vlgmr.msra.gmra.mxu0 %vm258_vm1, %v255_v7  ;;  %v322_v25 = vsel %vm320_vm3, %v257_v24, 0  ;;  %v1083_v36 = vld [vmem:[%s1302_s23] ss:$0 sps:$4 sm:$0xff]  }
  0x21   : > { %633 = vrot.lane.b32.xlu0 %v1081_v8, %s1170_s15  ;;  %982 = vmatprep.mubr.msk.bf16.mxu0 %vm1167_vm0, %v1166_v0  ;;  %v1085_v40 = vld [vmem:[%s1302_s23] ss:$0 sps:$4 sm:$0xff]  }
  0x22   : > { %628 = vrot.lane.b32.xlu1 %v1082_v9, %s1170_s15  ;;  %981 = vmatpush3.bf16.msra.mxu0 %v322_v25  ;;  %v1084_v46 = vld [vmem:[%s1302_s23] ss:$0 sps:$4 sm:$0xff]  }
  0x23   : > { %992 = vmatprep.subr.bf16.mxu0 %v1166_v0 }
  0x8b   : > { %v378_v10 = vpop.permute.xlu0 %377 }
  0x8c   : > { %v383_v11 = vsel %vm258_vm1, %v378_v10, 0  ;;  %v506_v12 = vpop.permute.xlu1 %505 }
  0x8d   : > { %987 = vmatpush3.bf16.xpose.msra.mxu1 %v383_v11  ;;  %v511_v14 = vsel %vm258_vm1, %v506_v12, 0 }
  0x8e   : > { %998 = vmatprep.subr.bf16.mxu1 %v1166_v0 }
  0x8f   : > { %v373_v13 = vpop.permute.xlu0 %372 }
  0x90   : > { %v501_v16 = vpop.permute.xlu1 %500 }
  0x93   : > { %v634_v15 = vpop.permute.xlu0 %633 }
  0x94   : > { %989 = vmatmul.mubr.msk.bf16.vlgmr.msra.gmra.mxu1 %vm258_vm1, %v373_v13  ;;  %v639_v17 = vsel %vm258_vm1, %v634_v15, 0  ;;  %v629_v18 = vpop.permute.xlu1 %628 }
  0x95   : > { %999 = vmatpush3.bf16.xpose.msra.mxu1 %v511_v14  ;;  %1000 = vmatprep.mubr.msk.bf16.mxu1 %vm1167_vm0, %v1166_v0 }
  0x96   : > { %1010 = vmatprep.subr.bf16.mxu1 %v1166_v0 }
  0x9c   : > { %1001 = vmatmul.mubr.msk.bf16.vlgmr.msra.gmra.mxu1 %vm258_vm1, %v501_v16 }
  0x9d   : > { %1011 = vmatpush3.bf16.xpose.msra.mxu1 %v639_v17  ;;  %1012 = vmatprep.mubr.msk.bf16.mxu1 %vm1167_vm0, %v1166_v0 }
  0x9e   : > { %1022 = vmatprep.subr.bf16.mxu1 %v1166_v0 }
  0xa4   : > { %1013 = vmatmul.mubr.msk.bf16.vlgmr.msra.gmra.mxu1 %vm258_vm1, %v629_v18 }
  0xa5   : > { %1026 = vmatprep.mubr.msk.bf16.mxu1 %vm1167_vm0, %v1166_v0 }
  0xe0   : > { %v299_v19 = vpop.f32.mrf.mxu0 }
  0xe1   : > { %v306_v20 = vsel %vm305_vm2, %v299_v19, -inf }
  0xe2   : > { %307 = vmax.xlane.f32.xlu0 %v306_v20  ;;  %v978_v21 = vpop.f32.mrf.mxu0  ;;  %v1086_v20 = vld [vmem:[%s1398_s3 + $0x8] sm:$0xff]  }
  0xe3   : > { %v781_v24 = vsel %vm773_vm4, %v1086_v20, 0 }
  0xe4   : > { %v302_v22 = vpop.f32.mrf.mxu0  ;;  %1023 = vmatpush3.bf16.xpose.msra.mxu1 %v781_v24 }
  0xe5   : > { %1024 = vmatprep.subr.bf16.mxu1 %v1166_v0 }
  0xe6   : > { %v979_v23 = vpop.f32.mrf.mxu0 }
 0x154   : > { %v419_v26 = vpop.f32.mrf.mxu1 }
 0x155   : > { %v425_v27 = vsel %vm305_vm2, %v419_v26, -inf }
 0x156   : > { %426 = vmax.xlane.f32.xlu1 %v425_v27  ;;  %v990_v28 = vpop.f32.mrf.mxu1 }
 0x158   : > { %v422_v29 = vpop.f32.mrf.mxu1 }
 0x159   : > { %v1087_v29 = vld [vmem:[%s1398_s3] sm:$0xff]  }
 0x15a   : > { %v991_v30 = vpop.f32.mrf.mxu1 }
 0x15c   : > { %v547_v31 = vpop.f32.mrf.mxu1 }
 0x15d   : > { %v553_v32 = vsel %vm305_vm2, %v547_v31, -inf }
 0x15e   : > { %v1002_v33 = vpop.f32.mrf.mxu1  ;;  %554 = vmax.xlane.f32.xlu0 %v553_v32  ;;  %v778_v32 = vsel %vm773_vm4, %v1087_v29, 0 }
 0x15f   : > { %1025 = vmatpush3.bf16.xpose.msra.mxu1 %v778_v32 }
 0x160   : > { %v550_v34 = vpop.f32.mrf.mxu1 }
 0x162   : > { %v1003_v35 = vpop.f32.mrf.mxu1 }
 0x164   : > { %v675_v37 = vpop.f32.mrf.mxu1 }
 0x165   : > { %v681_v38 = vsel %vm305_vm2, %v675_v37, -inf }
 0x166   : > { %v1014_v39 = vpop.f32.mrf.mxu1  ;;  %682 = vmax.xlane.f32.xlu0 %v681_v38 }
 0x167   : > { %439 = vrot.lane.b32.xlu1 %v1083_v36, %s1168_s13 }
 0x168   : > { %v678_v41 = vpop.f32.mrf.mxu1 }
 0x16a   : > { %v1015_v42 = vpop.f32.mrf.mxu1 }
 0x16b   : > { %v308_v43 = vpop.xlane.xlu0 %307  ;;  %695 = vrot.lane.b32.xlu1 %v1085_v40, %s1170_s15  ;;  %s241_s15 = scalar_lea.vmem [#allocation3], %s926_s11 }
 0x16c   : > { %v309_v44 = vsub.f32 %v299_v19, %v308_v43  ;;  %s839_s16 = sshll.u32 %s241_s15, 4  ;;  %s1356_s16 = int_to_ptr.vmem [resolvable:$true] %s839_s16 }
 0x16e   : > { %v310_v45 = vmul.f32 1.442695, %v309_v44 }
 0x170   : > { %1088 = vpow2.f32 %v310_v45 }
 0x17c   : > { %567 = vrot.lane.b32.xlu0 %v1084_v46, %s1169_s14  ;;  %s952_s14 = sshll.u32 %s1226_s22, 7  ;;  %s1104_s22 = scalar_lea.vmem %s1356_s16, 128 }
 0x17d   : > { %v1089_v47 = vpop.eup %1088  ;;  %s1354_s25 = scalar_lea.hbm %s1400_s5, %s952_s14  ;;  %p1105_p11 = scmp.ne.s32.totalorder %s1356_s16, %s1104_s22 }
 0x17e   : > { %v316_v48 = vpack.c.bf16 %v1089_v47, %v1089_v47  ;;  %v312_v2 = vsel %vm305_vm2, %v1089_v47, 0.0  ;;  %v947_v47 = vld [vmem:[%s1399_s4] ss:$0 sm:$0xff] }
 0x17f   : > { %p1106_p12 = pnand %p1105_p11, %p1243_p5 }
 0x180   : > { %983 = vmatmul.mubr.msk.bf16.vlgmr.msra.gmra.mxu0 %vm305_vm2, %v316_v48 }
 0x181   : > { %994 = vmatprep.mubr.msk.bf16.mxu0 %vm1167_vm0, %v1166_v0  ;;  %p1107_p13 = pneg %p1106_p12 }
 0x1df   : > { %v427_v49 = vpop.xlane.xlu1 %426 }
 0x1e0   : > { %v428_v50 = vsub.f32 %v419_v26, %v427_v49 }
 0x1e2   : > { %v429_v51 = vmul.f32 1.442695, %v428_v50 }
 0x1e3   : > { %v440_v52 = vpop.permute.xlu1 %439 }
 0x1e4   : > { %1090 = vpow2.f32 %v429_v51  ;;  %v445_v53 = vsel %vm320_vm3, %v440_v52, 0 }
 0x1e5   : > { %993 = vmatpush3.bf16.msra.mxu0 %v445_v53 }
 0x1e6   : > { %1004 = vmatprep.subr.bf16.mxu0 %v1166_v0 }
 0x1e7   : > { %v555_v54 = vpop.xlane.xlu0 %554  ;;  %v696_v3 = vpop.permute.xlu1 %695 }
 0x1e8   : > { %v556_v55 = vsub.f32 %v547_v31, %v555_v54  ;;  %v701_v5 = vsel %vm320_vm3, %v696_v3, 0 }
 0x1ea   : > { %v557_v56 = vmul.f32 1.442695, %v556_v55 }
 0x1ec   : > { %1092 = vpow2.f32 %v557_v56 }
 0x1ef   : > { %v683_v57 = vpop.xlane.xlu0 %682 }
 0x1f0   : > { %v684_v58 = vsub.f32 %v675_v37, %v683_v57 }
 0x1f1   : > { %v1091_v59 = vpop.eup %1090 }
 0x1f2   : > { %v685_v60 = vmul.f32 1.442695, %v684_v58  ;;  %v431_v61 = vsel %vm305_vm2, %v1091_v59, 0.0  ;;  %v435_v62 = vpack.c.bf16 %v1091_v59, %v1091_v59 }
 0x1f3   : > { %432 = vadd.xlane.f32.xlu1 %v431_v61  ;;  %v568_v63 = vpop.permute.xlu0 %567 }
 0x1f4   : > { %1094 = vpow2.f32 %v685_v60  ;;  %v573_v1 = vsel %vm320_vm3, %v568_v63, 0  ;;  %995 = vmatmul.mubr.msk.bf16.vlgmr.msra.gmra.mxu0 %vm305_vm2, %v435_v62 }
 0x1f5   : > { %1005 = vmatpush3.bf16.msra.mxu0 %v573_v1  ;;  %1006 = vmatprep.mubr.msk.bf16.mxu0 %vm1167_vm0, %v1166_v0 }
 0x1f6   : > { %1016 = vmatprep.subr.bf16.mxu0 %v1166_v0 }
 0x1f7   : > { %313 = vadd.xlane.f32.xlu1 %v312_v2 }
 0x1f9   : > { %v1093_v4 = vpop.eup %1092 }
 0x1fa   : > { %v559_v6 = vsel %vm305_vm2, %v1093_v4, 0.0  ;;  %v563_v7 = vpack.c.bf16 %v1093_v4, %v1093_v4 }
 0x1fb   : > { %560 = vadd.xlane.f32.xlu0 %v559_v6 }
 0x1fc   : > { %1007 = vmatmul.mubr.msk.bf16.vlgmr.msra.gmra.mxu0 %vm305_vm2, %v563_v7 }
 0x1fd   : > { %1017 = vmatpush3.bf16.msra.mxu0 %v701_v5  ;;  %1018 = vmatprep.mubr.msk.bf16.mxu0 %vm1167_vm0, %v1166_v0 }
 0x201   : > { %v1095_v8 = vpop.eup %1094 }
 0x202   : > { %v687_v9 = vsel %vm305_vm2, %v1095_v8, 0.0  ;;  %v691_v10 = vpack.c.bf16 %v1095_v8, %v1095_v8 }
 0x203   : > { %688 = vadd.xlane.f32.xlu0 %v687_v9 }
 0x204   : > { %1019 = vmatmul.mubr.msk.bf16.vlgmr.msra.gmra.mxu0 %vm305_vm2, %v691_v10 }
 0x240   : > { %v358_v11 = vpop.f32.mrf.mxu0 }
 0x242   : > { %v984_v12 = vpop.f32.mrf.mxu0 }
 0x244   : > { %v361_v13 = vpop.f32.mrf.mxu0 }
 0x246   : > { %v985_v14 = vpop.f32.mrf.mxu0 }
 0x27c   : > { %v433_v15 = vpop.xlane.xlu1 %432 }
 0x280   : > { %v314_v16 = vpop.xlane.xlu1 %313 }
 0x281   : > { %1096 = vrcp.f32 %v314_v16 }
 0x282   : > { %1098 = vrcp.f32 %v433_v15 }
 0x284   : > { %v561_v19 = vpop.xlane.xlu0 %560 }
 0x285   : > { %1100 = vrcp.f32 %v561_v19 }
 0x28c   : > { %v689_v22 = vpop.xlane.xlu0 %688 }
 0x28d   : > { %1102 = vrcp.f32 %v689_v22 }
 0x28e   : > { %v1097_v17 = vpop.eup %1096 }
 0x28f   : > { %v364_v18 = vmul.f32 %v1097_v17, %v358_v11  ;;  %v1099_v21 = vpop.eup %1098 }
 0x291   : > { %365 = vst.msk [vmem:[#allocation2] sm:$0xff] %vm258_vm1, %v364_v18 }
 0x292   : > { %v1101_v30 = vpop.eup %1100 }
 0x29a   : > { %v1103_v36 = vpop.eup %1102 }
 0x2b4   : > { %v481_v23 = vpop.f32.mrf.mxu0 }
 0x2b5   : > { %v487_v25 = vmul.f32 %v1099_v21, %v481_v23 }
 0x2b6   : > { %v996_v26 = vpop.f32.mrf.mxu0 }
 0x2b7   : > { %489 = vrot.lane.b32.xlu0 %v487_v25, %s1171_s30  ;;  %s1174_s30 = smov [#allocation3]  }
 0x2b8   : > { %v484_v27 = vpop.f32.mrf.mxu0  ;;  %s1108_s6 = sshll.u32 %s1174_s30, 4  ;;  %s1109_s6 = int_to_ptr.vmem [resolvable:$false] %s1108_s6 }
 0x2b9   : > { %s1110_s7 = scalar_lea.vmem %s1109_s6, 256  ;;  %p1111_p0 = scmp.lt.s32.totalorder %s1356_s16, %s1109_s6 }
 0x2ba   : > { %v997_v28 = vpop.f32.mrf.mxu0  ;;  %p1112_p1 = scmp.lt.s32.totalorder %s1110_s7, %s1104_s22 }
 0x2bc   : > { %v609_v31 = vpop.f32.mrf.mxu0  ;;  %p1113_p2 = por %p1112_p1, %p1111_p0 }
 0x2bd   : > { %v615_v33 = vmul.f32 %v1101_v30, %v609_v31 }
 0x2be   : > { %v1008_v34 = vpop.f32.mrf.mxu0  ;;  %p1114_p3 = pnand %p1113_p2, %p1107_p13 }
 0x2bf   : > { %617 = vrot.lane.b32.xlu1 %v615_v33, %s1172_s8 }
 0x2c0   : > { %v612_v35 = vpop.f32.mrf.mxu0 }
 0x2c2   : > { %v1009_v0 = vpop.f32.mrf.mxu0 }
 0x2c4   : > { %v737_v37 = vpop.f32.mrf.mxu0 }
 0x2c5   : > { %v743_v38 = vmul.f32 %v1103_v36, %v737_v37 }
 0x2c6   : > { %v1020_v39 = vpop.f32.mrf.mxu0 }
 0x2c7   : > { %745 = vrot.lane.b32.xlu1 %v743_v38, %s1173_s9 }
 0x2c8   : > { %v740_v40 = vpop.f32.mrf.mxu0 }
 0x2ca   : > { %v1021_v41 = vpop.f32.mrf.mxu0 }
 0x329   : > { %v490_v42 = vpop.permute.xlu0 %489 }
 0x32a   : > { %493 = vst.msk [vmem:[#allocation2] sm:$0xff] %vm492_vm5, %v490_v42 }
 0x331   : > { %v618_v43 = vpop.permute.xlu1 %617 }
 0x332   : > { %621 = vst.msk [vmem:[#allocation2] sm:$0xff] %vm620_vm6, %v618_v43 }
 0x339   : > { %v746_v44 = vpop.permute.xlu1 %745 }
 0x33a   : > { %749 = vst.msk [vmem:[#allocation2] sm:$0xff] %vm748_vm7, %v746_v44 }
 0x341   : > { %v750_v45 = vld [vmem:[#allocation2] sm:$0xff] }
 0x342   : > { %v751_v46 = vpack.c.bf16 %v750_v45, %v750_v45 }
 0x344   : > { %1027 = vmatmul.mubr.msk.bf16.vlgmr.msra.gmra.mxu1 %vm773_vm4, %v751_v46 }
 0x404   : > { %v817_v48 = vpop.f32.mrf.mxu1 }
 0x405   : > { %v818_v49 = vadd.f32 %v947_v47, %v817_v48 }
 0x406   : > { %v1028_v50 = vpop.f32.mrf.mxu1 }
 0x407   : > { %824 = vst.msk [vmem:[%s241_s15] sm:$0xff] %vm823_vm8, %v818_v49 }
 0x408   : > { %v820_v51 = vpop.f32.mrf.mxu1 }
 0x409   : > { %1117 = shalt.err (!%p1114_p3)
}
 0x40a   : > { %s1118_s8 = scalar_lea.hbm %s1354_s25, 128  ;;  %s1122_s11 = scalar_lea.hbm %s1400_s5, 256 }
 0x40b   : > { %p1119_p4 = scmp.ne.s32.totalorder %s1354_s25, %s1118_s8  ;;  %p1123_p9 = scmp.lt.s32.totalorder %s1354_s25, %s1400_s5 }
 0x40c   : > { %p1124_p10 = scmp.lt.s32.totalorder %s1122_s11, %s1118_s8 }
 0x40d   : > { %p1120_p7 = pnand %p1119_p4, %p1243_p5 }
 0x40e   : > { %p1125_p11 = por %p1124_p10, %p1123_p9 }
 0x40f   : > { %p1121_p8 = pneg %p1120_p7 }
 0x411   : > { %p1126_p12 = pnand %p1125_p11, %p1121_p8 }
 0x413   : > { %1129 = shalt.err (!%p1126_p12)
}
 0x414   : > { %1030 = dma.vmem_to_hbm [thread:$0]  (%p1243_p5), %s1356_s16, 128, %s1354_s25, %s826_s26   ;;  %v1029_v52 = vpop.f32.mrf.mxu1 }
 0x415 PF: > { %p1036_p13 = scmp.ge.s32.totalorder %s1164_s21, 2  ;;  %s851_s14 = sand.u32 1, %s1152_s18  }
 0x416   : > { %s852_s15 = scalar_lea.sflag [#allocation4], %s851_s14 }
 0x417   : > { %p1033_p0 = pnand %p1036_p13, %p1247_p6 }
 0x419   : > { %p1034_p1 = pneg %p1033_p0 }
 0x41b   : > { %1147 = dma.done.wait (%p1034_p1), %s852_s15, 128  }
 0x41c   : > { %1149 = vsyncadd (%p1034_p1), %s852_s15, 4294967168  ;;  %p15_p2 = scmp.ge.s32.totalorder %s1230_s24, 4   ;;  %s1403_s18 = smov %s1156_s19 }
 0x41d   : > { %s1404_s19 = smov %s1160_s20  ;;  %s1405_s20 = smov %s1241_s27 }
 0x41e   : > { %s1406_s21 = smov %s1230_s24  ;;  %17 = sbr.rel (!%p15_p2) target bundleno = 3 (0x3), region = 81 }
 0x423   :  { %857 = vsyncpa [#allocation4], 1 }
 0x424   :  { %859 = vsyncpa [#allocation4 + $0x1], 1 }

</bundles_post_ra>
